<compile_context>
chip_gen: v5e
topology: v5e:2x2
jax: 0.10.0
libtpu: 0.0.40
codegen_flags: <defaults>
</compile_context>

<pallas_src>
import jax
import jax.numpy as jnp
from jax.experimental import pallas as pl
from jax.experimental.pallas import tpu as pltpu


def _snapshot_kernel(pos_ref, old_neg_hbm_ref, neg_ref):
    # old_neg_hbm_ref is the carried `negative` buffer living in HBM; it is
    # aliased to the output buffer (in-place overwrite) and never read here.
    del old_neg_hbm_ref
    neg_ref[...] = pos_ref[...]


def _snapshot_negative(positive_2d: jnp.ndarray,
                       old_negative_2d: jnp.ndarray,
                       *,
                       tile_rows: int = 512) -> jnp.ndarray:
    """Tiled, dtype-preserving copy of `positive_2d` into the negative buffer."""
    batch, hidden = positive_2d.shape
    dtype_bytes = jnp.dtype(positive_2d.dtype).itemsize

    # Budget ~24 MiB for the 4 live VMEM tiles (input + output, each
    # double-buffered) — sized against v7x's smaller VMEM, fine on v5e/v6e.
    vmem_budget_bytes = 24 * 1024 * 1024
    max_rows = max(8, vmem_budget_bytes // (4 * hidden * dtype_bytes))
    tile_b = min(batch, tile_rows, max_rows)
    if tile_b < batch:
        # Sub-full tiles must be sublane-aligned (multiple of 8).
        tile_b = max(8, (tile_b // 8) * 8)

    grid = (pl.cdiv(batch, tile_b),)

    return pl.pallas_call(
        _snapshot_kernel,
        out_shape=jax.ShapeDtypeStruct(positive_2d.shape, positive_2d.dtype),
        grid=grid,
        in_specs=[
            pl.BlockSpec((tile_b, hidden), lambda i: (i, 0)),
            # Carried negative buffer: stays in HBM, no auto-DMA; it is only
            # here so its storage can be aliased to the output.
            pl.BlockSpec(memory_space=pl.ANY),
        ],
        out_specs=pl.BlockSpec((tile_b, hidden), lambda i: (i, 0)),
        input_output_aliases={1: 0},  # overwrite the old negative buffer in place
        compiler_params=pltpu.CompilerParams(
            dimension_semantics=("parallel",),       # shard tiles across v7x's 2 TCs
            vmem_limit_bytes=48 * 1024 * 1024,
        ),
    )(positive_2d, old_negative_2d)


def in_batch_negative_sampler(positive: jnp.ndarray,
                              positive_id: jnp.ndarray,
                              state=None,
                              training: bool = True,
                              tile_rows: int = 512):
    """Functional mirror of InBatchNegativeSampler.forward.

    Returns ((positive, positive_id), new_state) where `state` carries the
    `negative` / `negative_id` buffers between calls.
    """
    if state is None:
        # Functional stand-in for the module's registered zero buffers, shaped
        # to match the inputs so the state pytree is stable across steps.
        state = {
            "negative": jnp.zeros(positive.shape, positive.dtype),
            "negative_id": jnp.zeros(positive_id.shape, positive_id.dtype),
        }

    if not training:
        # Eval mode: buffers are left untouched; forward is identity.
        return (positive, positive_id), state

    # Flatten trailing dims so the copy tile is lane-dense ([batch, features]).
    batch = positive.shape[0]
    pos_2d = positive.reshape(batch, -1)

    old_neg = state["negative"]
    if old_neg.shape != positive.shape or old_neg.dtype != positive.dtype:
        old_neg = jnp.zeros_like(positive)
    old_neg_2d = old_neg.reshape(batch, -1)

    negative = _snapshot_negative(pos_2d, old_neg_2d,
                                  tile_rows=tile_rows).reshape(positive.shape)

    new_state = {
        "negative": negative,
        # IDs: JAX arrays are immutable, so the snapshot is a free alias in the
        # original dtype; a [batch, 1] copy kernel would waste 127/128 lanes.
        "negative_id": positive_id,
    }
    # forward() returns the inputs unchanged.
    return (positive, positive_id), new_state


if __name__ == "__main__":
    key = jax.random.PRNGKey(0)
    k_pos, k_id = jax.random.split(key)

    batch, hidden = 8, 32
    positive = jax.random.normal(k_pos, (batch, hidden), dtype=jnp.float32)
    positive_id = jax.random.randint(k_id, (batch,), 0, 1000, dtype=jnp.int32)

    # Training step: buffers get overwritten with the in-batch positives.
    (out_pos, out_id), state = in_batch_negative_sampler(
        positive, positive_id, state=None, training=True
    )
    jax.block_until_ready((out_pos, out_id, state["negative"], state["negative_id"]))

    assert out_pos.shape == positive.shape and out_id.shape == positive_id.shape
    assert out_pos.dtype == positive.dtype and out_id.dtype == positive_id.dtype
    assert jnp.array_equal(out_pos, positive)
    assert jnp.array_equal(out_id, positive_id)
    # Buffers now hold a snapshot of the positives, in the original dtypes.
    assert state["negative"].dtype == positive.dtype
    assert state["negative_id"].dtype == positive_id.dtype
    assert jnp.array_equal(state["negative"], positive)
    assert jnp.array_equal(state["negative_id"], positive_id)

    # Eval step: forward is identity and buffers are left untouched.
    (ep, ei), eval_state = in_batch_negative_sampler(
        positive * 2.0, positive_id + 1, state=state, training=False
    )
    jax.block_until_ready((ep, ei))
    assert jnp.array_equal(eval_state["negative"], positive)
    assert jnp.array_equal(eval_state["negative_id"], positive_id)

    print("KERNEL_OK")
</pallas_src>

<mosaic_0001>
module attributes {stable_mosaic.version = 11 : i64} {
  func.func @_snapshot_kernel(%arg0: i32, %arg1: memref<8x32xf32, #tpu.memory_space<vmem>>, %arg2: memref<8x32xf32, #tpu.memory_space<any>>, %arg3: memref<8x32xf32, #tpu.memory_space<vmem>>) attributes {dimension_semantics = [#tpu.dimension_semantics<parallel>], iteration_bounds = array<i64: 1>, scalar_prefetch = 0 : i64, scratch_operands = 0 : i64, tpu.core_type = #tpu.core_type<tc>, window_params = [{transform_indices = @transform_0, window_bounds = array<i64: 8, 32>}, {}, {transform_indices = @transform_2, window_bounds = array<i64: 8, 32>}]} {
    %c0 = arith.constant 0 : index
    %c0_0 = arith.constant 0 : index
    %0 = vector.load %arg1[%c0, %c0_0] : memref<8x32xf32, #tpu.memory_space<vmem>>, vector<8x32xf32>
    %c0_1 = arith.constant 0 : index
    %c0_2 = arith.constant 0 : index
    %1 = vector.load %arg3[%c0_1, %c0_2] : memref<8x32xf32, #tpu.memory_space<vmem>>, vector<8x32xf32>
    tpu.vector_store %arg3[%c0_1, %c0_2], %0 {strides = array<i32>} : memref<8x32xf32, #tpu.memory_space<vmem>>, vector<8x32xf32>,
    return
  }
  func.func @transform_0(%arg0: i32) -> (i32, i32) {
    %c0_i32 = arith.constant 0 : i32
    %c0_i32_0 = arith.constant 0 : i32
    return %arg0, %c0_i32 : i32, i32
  }
  func.func @transform_2(%arg0: i32) -> (i32, i32) {
    %c0_i32 = arith.constant 0 : i32
    %c0_i32_0 = arith.constant 0 : i32
    return %arg0, %c0_i32 : i32, i32
  }
}

</mosaic_0001>

<bundles_post_ra>
// kernel: tpu_custom_call.1
= control target key start
LH: loop header
LB: loop body
LE: loop exit
PB: predicated region body
PF: predicated region fallthrough
CT: control target
= control target key end

     0   :  { %vm11_vm0 = vcmask 261120   ;;  %s78_s0 = inlined_call_operand.vmem [shape: f32[8,32], index: 0, kind: input, shape index: {}]   ;;  %s79_s1 = inlined_call_operand.hbm [shape: f32[8,32], index: 1, kind: input, shape index: {}, may-alias: {1,2}]   ;;  %s80_s2 = inlined_call_operand.hbm [shape: f32[8,32], index: 2, kind: output, shape index: {}, may-alias: {1,2}]  }
   0x1   :  { %v10_v0 = vld [vmem:[%s78_s0] sm:$0xff] }
   0x2   :  { %7 = vsyncpa [#allocation3], 0  ;;  %s20_s13 = sshll.u32 %s80_s2, 4  ;;  %12 = vst.msk [vmem:[#allocation2] sm:$0xff] %vm11_vm0, %v10_v0  ;;  %s56_s14 = smov [#allocation2]   ;;  %s21_s13 = int_to_ptr.hbm [resolvable:$true] %s20_s13 }
   0x3   :  { %s18_s15 = sshll.u32 %s56_s14, 4  ;;  %s19_s15 = int_to_ptr.vmem [resolvable:$true] %s18_s15 }
   0x4   :  { %23 = dma.vmem_to_hbm [thread:$0]  %s19_s15, 128, %s21_s13, [#allocation3]  }
   0x5   :  { %54 = dma.done.wait [#allocation3], 128  }
   0x6   :  { %55 = vsyncadd [#allocation3], 4294967168 }
   0x7   :  { %28 = vsyncpa [#allocation3], 1 }

</bundles_post_ra>
